<compile_context>
chip_gen: v5e
topology: v5e:2x2
jax: 0.10.0
libtpu: 0.0.40
codegen_flags: <defaults>
</compile_context>

<pallas_src>
import functools
import math

import jax
import jax.numpy as jnp
from jax.experimental import pallas as pl
from jax.experimental.pallas import tpu as pltpu


_VMEM_LIMIT_BYTES = 32 * 1024 * 1024   # safe on v5e/v6e/v7x; tiles below stay far under it


def autopad(k, p=None, d=1):
    """Same as the PyTorch helper; for the 1x1 convs in this block it yields p=0."""
    if d > 1:
        k = d * (k - 1) + 1 if isinstance(k, int) else [d * (x - 1) + 1 for x in k]
    if p is None:
        p = k // 2 if isinstance(k, int) else [x // 2 for x in k]
    return p


def _pick_spatial_tile(hw, batch, c):
    """Lane (spatial) tile: a multiple of 128 dividing H*W, as large as a conservative
    VMEM budget allows (v7x: 64 MiB total), while keeping >= 4 grid steps so both v7x
    TensorCores stay busy and DMA remains pipelined."""
    # per spatial column the fused kernel holds ~6 C-row f32 slabs (x, x*g, x1, h=2C, y)
    vmem_cap_cols = (8 << 20) // (4 * 6 * max(c, 1))
    cap = min(2048, max(128, (vmem_cap_cols // 128) * 128))
    cands = [t for t in range(128, min(hw, cap) + 1, 128) if hw % t == 0]
    if not cands:
        return hw                 # small / odd H*W: take the full spatial extent as one block
    for t in reversed(cands):
        if batch * (hw // t) >= 4:
            return t
    return cands[0]


def _fold_bn(gamma, beta, mean, var, eps):
    scale = gamma / jnp.sqrt(var + eps)
    return scale, beta - mean * scale


# ---------------------------------------------------------------------------
# Kernel 1: global average pool over the spatial (lane) dim, tiled + accumulated
# ---------------------------------------------------------------------------
def _global_avgpool_kernel(x_ref, o_ref, acc_ref, *, inv_hw):
    # grid = (B, HW // ts); x block (1, C, ts); out block (1, C, 1); acc scratch (C, 1)
    s = pl.program_id(1)

    @pl.when(s == 0)
    def _():
        acc_ref[...] = jnp.zeros_like(acc_ref)

    acc_ref[...] += jnp.sum(x_ref[0], axis=-1, keepdims=True)      # lane reduction (XLU)

    @pl.when(s == pl.num_programs(1) - 1)
    def _():
        o_ref[0] = (acc_ref[...] * inv_hw).astype(o_ref.dtype)


# ---------------------------------------------------------------------------
# Kernel 2: fused SE-gate (+residual) + FFN conv1x1/BN/SiLU + conv1x1/BN (+residual)
# ---------------------------------------------------------------------------
def _psa_main_kernel(x_ref, g_ref, w1_ref, s1_ref, b1_ref, w2_ref, s2_ref, b2_ref,
                     o_ref, *, shortcut):
    x = x_ref[0]                          # (C, ts)  f32, spatial lane-dense
    gate = g_ref[0]                       # (C, 1)   per-batch gate, lane-broadcast
    xg = x * gate                         # attn(x) = x * sigmoid(fc2(fc1(pool(x))))
    x1 = x + xg if shortcut else xg       # x = x + attn(x)

    # FFN conv1x1 (C -> 2C) + folded BN + SiLU   (f32 MXU accumulation)
    h = jnp.dot(w1_ref[...], x1, preferred_element_type=jnp.float32)   # (2C, ts)
    h = h * s1_ref[...] + b1_ref[...]
    h = h * jax.nn.sigmoid(h)             # SiLU, f32 epilogue (v5e-friendly)

    # FFN conv1x1 (2C -> C) + folded BN (no activation)
    y = jnp.dot(w2_ref[...], h, preferred_element_type=jnp.float32)    # (C, ts)
    y = y * s2_ref[...] + b2_ref[...]

    o_ref[0] = (x1 + y if shortcut else y).astype(o_ref.dtype)


# ---------------------------------------------------------------------------
# Wrapper: NCHW in, NCHW out, no transposes (only free reshapes of trailing dims)
# ---------------------------------------------------------------------------
def simple_psa_block_pallas(x_nchw, params, *, eps=1e-3, shortcut=True):
    B, C, H, W = x_nchw.shape
    HW = H * W
    C4 = params["fc1"]["w"].shape[0]      # C // 4
    C2f = params["ffn1"]["w"].shape[0]    # 2 * C

    x3 = x_nchw.reshape(B, C, HW)         # free view (no data movement)
    ts = _pick_spatial_tile(HW, B, C)
    n_s = HW // ts

    # ---- kernel 1: global average pool (one HBM read of x) ----
    pooled = pl.pallas_call(
        functools.partial(_global_avgpool_kernel, inv_hw=1.0 / HW),
        out_shape=jax.ShapeDtypeStruct((B, C, 1), jnp.float32),
        grid_spec=pltpu.PrefetchScalarGridSpec(
            num_scalar_prefetch=0,
            grid=(B, n_s),
            in_specs=[pl.BlockSpec((1, C, ts), lambda b, s: (b, 0, s))],
            out_specs=pl.BlockSpec((1, C, 1), lambda b, s: (b, 0, 0)),
            scratch_shapes=[pltpu.VMEM((C, 1), jnp.float32)],
        ),
        compiler_params=pltpu.CompilerParams(
            dimension_semantics=("parallel", "arbitrary"),
            vmem_limit_bytes=_VMEM_LIMIT_BYTES),
    )(x3)

    # ---- squeeze-excitation MLP on the pooled (B, C) vector ----
    # TODO(synk): kept in plain JAX on purpose: it operates on only B*C values (64 floats
    # here); running it on the MXU would require padding to 8x128 tiles for zero HBM/FLOP
    # benefit.  Everything that scales with H*W lives inside the Pallas kernels.
    s_fc1, b_fc1 = _fold_bn(params["fc1"]["gamma"], params["fc1"]["beta"],
                            params["fc1"]["mean"], params["fc1"]["var"], eps)
    s_fc2, b_fc2 = _fold_bn(params["fc2"]["gamma"], params["fc2"]["beta"],
                            params["fc2"]["mean"], params["fc2"]["var"], eps)
    w_fc1 = params["fc1"]["w"][:, :, 0, 0]            # (C/4, C)
    w_fc2 = params["fc2"]["w"][:, :, 0, 0]            # (C, C/4)
    p = pooled[:, :, 0]                               # (B, C)
    hp = jnp.dot(p, w_fc1.T, precision=jax.lax.Precision.HIGHEST) * s_fc1 + b_fc1
    hp = hp * jax.nn.sigmoid(hp)                      # SiLU
    gp = jnp.dot(hp, w_fc2.T, precision=jax.lax.Precision.HIGHEST) * s_fc2 + b_fc2
    gate = jax.nn.sigmoid(gp)[:, :, None]             # (B, C, 1)

    # ---- kernel 2: fused gate + residual + FFN + residual (1 read + 1 write) ----
    s_ffn1, b_ffn1 = _fold_bn(params["ffn1"]["gamma"], params["ffn1"]["beta"],
                              params["ffn1"]["mean"], params["ffn1"]["var"], eps)
    s_ffn2, b_ffn2 = _fold_bn(params["ffn2"]["gamma"], params["ffn2"]["beta"],
                              params["ffn2"]["mean"], params["ffn2"]["var"], eps)
    w_ffn1 = params["ffn1"]["w"][:, :, 0, 0]          # (2C, C)
    w_ffn2 = params["ffn2"]["w"][:, :, 0, 0]          # (C, 2C)

    out3 = pl.pallas_call(
        functools.partial(_psa_main_kernel, shortcut=shortcut),
        out_shape=jax.ShapeDtypeStruct((B, C, HW), jnp.float32),
        grid_spec=pltpu.PrefetchScalarGridSpec(
            num_scalar_prefetch=0,
            grid=(B, n_s),
            in_specs=[
                pl.BlockSpec((1, C, ts), lambda b, s: (b, 0, s)),    # x tile
                pl.BlockSpec((1, C, 1), lambda b, s: (b, 0, 0)),     # per-batch gate
                pl.BlockSpec((C2f, C), lambda b, s: (0, 0)),         # ffn1 weight (resident)
                pl.BlockSpec((C2f, 1), lambda b, s: (0, 0)),         # ffn1 BN scale
                pl.BlockSpec((C2f, 1), lambda b, s: (0, 0)),         # ffn1 BN bias
                pl.BlockSpec((C, C2f), lambda b, s: (0, 0)),         # ffn2 weight (resident)
                pl.BlockSpec((C, 1), lambda b, s: (0, 0)),           # ffn2 BN scale
                pl.BlockSpec((C, 1), lambda b, s: (0, 0)),           # ffn2 BN bias
            ],
            out_specs=pl.BlockSpec((1, C, ts), lambda b, s: (b, 0, s)),
        ),
        compiler_params=pltpu.CompilerParams(
            dimension_semantics=("parallel", "parallel"),
            vmem_limit_bytes=_VMEM_LIMIT_BYTES),
    )(x3, gate,
      w_ffn1, s_ffn1.reshape(C2f, 1), b_ffn1.reshape(C2f, 1),
      w_ffn2, s_ffn2.reshape(C, 1), b_ffn2.reshape(C, 1))

    return out3.reshape(B, C, H, W)       # free view back to NCHW (no transpose)


# ---------------------------------------------------------------------------
# Plain-JAX reference (matches PyTorch SimplePSABlock in eval mode)
# ---------------------------------------------------------------------------
def simple_psa_block_ref(x, params, eps=1e-3, shortcut=True):
    def conv_bn(x, p, act):
        w = p["w"][:, :, 0, 0]
        y = jnp.einsum("oc,bchw->bohw", w, x, precision=jax.lax.Precision.HIGHEST)
        scale = (p["gamma"] / jnp.sqrt(p["var"] + eps)).reshape(1, -1, 1, 1)
        bias = (p["beta"] - p["mean"] * p["gamma"] / jnp.sqrt(p["var"] + eps)).reshape(1, -1, 1, 1)
        y = y * scale + bias
        return y * jax.nn.sigmoid(y) if act else y

    y = jnp.mean(x, axis=(2, 3), keepdims=True)
    y = conv_bn(y, params["fc1"], True)
    y = conv_bn(y, params["fc2"], False)
    gate = jax.nn.sigmoid(y)
    attn = x * gate
    x1 = x + attn if shortcut else attn
    f = conv_bn(x1, params["ffn1"], True)
    f = conv_bn(f, params["ffn2"], False)
    return x1 + f if shortcut else f


def _make_conv_params(key, c_out, c_in):
    kw, kg, kb, km, kv = jax.random.split(key, 5)
    return {
        "w": jax.random.normal(kw, (c_out, c_in, 1, 1), jnp.float32) / math.sqrt(c_in),
        "gamma": 1.0 + 0.1 * jax.random.normal(kg, (c_out,), jnp.float32),
        "beta": 0.1 * jax.random.normal(kb, (c_out,), jnp.float32),
        "mean": 0.1 * jax.random.normal(km, (c_out,), jnp.float32),
        "var": jnp.abs(1.0 + 0.1 * jax.random.normal(kv, (c_out,), jnp.float32)),
    }


if __name__ == "__main__":
    # SimplePSABlock(c=32, shortcut=True) on a small NCHW input.
    B, C, H, W = 2, 32, 16, 16
    key = jax.random.PRNGKey(0)
    kx, k1, k2, k3, k4 = jax.random.split(key, 5)

    x = jax.random.normal(kx, (B, C, H, W), dtype=jnp.float32)
    params = {
        "fc1": _make_conv_params(k1, C // 4, C),     # SimpleAttention.fc1
        "fc2": _make_conv_params(k2, C, C // 4),     # SimpleAttention.fc2 (act=False)
        "ffn1": _make_conv_params(k3, 2 * C, C),     # ffn[0]
        "ffn2": _make_conv_params(k4, C, 2 * C),     # ffn[1] (act=False)
    }

    fn = jax.jit(functools.partial(simple_psa_block_pallas, eps=1e-3, shortcut=True))
    out = jax.block_until_ready(fn(x, params))

    ref = simple_psa_block_ref(x, params, eps=1e-3, shortcut=True)
    assert out.shape == (B, C, H, W), out.shape
    max_err = float(jnp.max(jnp.abs(out - ref)))
    assert jnp.allclose(out, ref, atol=2e-3, rtol=2e-3), max_err

    print("KERNEL_OK")
</pallas_src>

<mosaic_0001>
module attributes {stable_mosaic.version = 11 : i64} {
  func.func @_global_avgpool_kernel(%arg0: i32, %arg1: i32, %arg2: memref<1x32x128xf32, #tpu.memory_space<vmem>>, %arg3: memref<1x32x1xf32, #tpu.memory_space<vmem>>, %arg4: memref<32x1xf32, #tpu.memory_space<vmem>>) attributes {dimension_semantics = [#tpu.dimension_semantics<parallel>, #tpu.dimension_semantics<arbitrary>], iteration_bounds = array<i64: 2, 2>, scalar_prefetch = 0 : i64, scratch_operands = 1 : i64, tpu.core_type = #tpu.core_type<tc>, window_params = [{transform_indices = @transform_0, window_bounds = array<i64: 1, 32, 128>}, {transform_indices = @transform_1, window_bounds = array<i64: 1, 32, 1>}]} {
    %c0_i32 = arith.constant 0 : i32
    %0 = arith.cmpi eq, %arg1, %c0_i32 : i32
    %1 = arith.extui %0 : i1 to i32
    %c0_i32_0 = arith.constant 0 : i32
    %2 = arith.cmpi ne, %1, %c0_i32_0 : i32
    scf.if %2 {
      %cst_8 = arith.constant 0.000000e+00 : f32
      %13 = vector.broadcast %cst_8 : f32 to vector<32x1xf32>
      %c0_9 = arith.constant 0 : index
      %c0_10 = arith.constant 0 : index
      %14 = vector.load %arg4[%c0_9, %c0_10] : memref<32x1xf32, #tpu.memory_space<vmem>>, vector<32x1xf32>
      tpu.vector_store %arg4[%c0_9, %c0_10], %13 {strides = array<i32>} : memref<32x1xf32, #tpu.memory_space<vmem>>, vector<32x1xf32>,
    } else {
    }
    %c0 = arith.constant 0 : index
    %c0_1 = arith.constant 0 : index
    %3 = vector.load %arg4[%c0, %c0_1] : memref<32x1xf32, #tpu.memory_space<vmem>>, vector<32x1xf32>
    %c0_2 = arith.constant 0 : index
    %c0_3 = arith.constant 0 : index
    %c0_4 = arith.constant 0 : index
    %4 = vector.load %arg2[%c0_2, %c0_3, %c0_4] : memref<1x32x128xf32, #tpu.memory_space<vmem>>, vector<1x32x128xf32>
    %5 = vector.shape_cast %4 : vector<1x32x128xf32> to vector<32x128xf32>
    %cst = arith.constant dense<0.000000e+00> : vector<32xf32>
    %6 = vector.multi_reduction <add>, %5, %cst [1] : vector<32x128xf32> to vector<32xf32>
    %7 = vector.shape_cast %6 : vector<32xf32> to vector<32x1xf32>
    %8 = arith.addf %3, %7 : vector<32x1xf32>
    %c0_5 = arith.constant 0 : index
    %c0_6 = arith.constant 0 : index
    %9 = vector.load %arg4[%c0_5, %c0_6] : memref<32x1xf32, #tpu.memory_space<vmem>>, vector<32x1xf32>
    tpu.vector_store %arg4[%c0_5, %c0_6], %8 {strides = array<i32>} : memref<32x1xf32, #tpu.memory_space<vmem>>, vector<32x1xf32>,
    %c1_i32 = arith.constant 1 : i32
    %10 = arith.cmpi eq, %arg1, %c1_i32 : i32
    %11 = arith.extui %10 : i1 to i32
    %c0_i32_7 = arith.constant 0 : i32
    %12 = arith.cmpi ne, %11, %c0_i32_7 : i32
    scf.if %12 {
      %c0_8 = arith.constant 0 : index
      %c0_9 = arith.constant 0 : index
      %13 = vector.load %arg4[%c0_8, %c0_9] : memref<32x1xf32, #tpu.memory_space<vmem>>, vector<32x1xf32>
      %cst_10 = arith.constant 3.906250e-03 : f32
      %14 = vector.broadcast %cst_10 : f32 to vector<32x1xf32>
      %15 = arith.mulf %13, %14 : vector<32x1xf32>
      %c0_11 = arith.constant 0 : index
      %c0_12 = arith.constant 0 : index
      %c0_13 = arith.constant 0 : index
      %16 = vector.load %arg3[%c0_11, %c0_12, %c0_13] : memref<1x32x1xf32, #tpu.memory_space<vmem>>, vector<1x32x1xf32>
      %17 = vector.shape_cast %16 : vector<1x32x1xf32> to vector<32x1xf32>
      %18 = vector.shape_cast %15 : vector<32x1xf32> to vector<1x32x1xf32>
      tpu.vector_store %arg3[%c0_11, %c0_12, %c0_13], %18 {strides = array<i32>} : memref<1x32x1xf32, #tpu.memory_space<vmem>>, vector<1x32x1xf32>,
    } else {
    }
    return
  }
  func.func @transform_0(%arg0: i32, %arg1: i32) -> (i32, i32, i32) {
    %c0_i32 = arith.constant 0 : i32
    %c0_i32_0 = arith.constant 0 : i32
    return %arg0, %c0_i32, %arg1 : i32, i32, i32
  }
  func.func @transform_1(%arg0: i32, %arg1: i32) -> (i32, i32, i32) {
    %c0_i32 = arith.constant 0 : i32
    %c0_i32_0 = arith.constant 0 : i32
    %c0_i32_1 = arith.constant 0 : i32
    return %arg0, %c0_i32, %c0_i32_0 : i32, i32, i32
  }
}

module attributes {stable_mosaic.version = 11 : i64} {
  func.func @_psa_main_kernel(%arg0: i32, %arg1: i32, %arg2: memref<1x32x128xf32, #tpu.memory_space<vmem>>, %arg3: memref<1x32x1xf32, #tpu.memory_space<vmem>>, %arg4: memref<64x32xf32, #tpu.memory_space<vmem>>, %arg5: memref<64x1xf32, #tpu.memory_space<vmem>>, %arg6: memref<64x1xf32, #tpu.memory_space<vmem>>, %arg7: memref<32x64xf32, #tpu.memory_space<vmem>>, %arg8: memref<32x1xf32, #tpu.memory_space<vmem>>, %arg9: memref<32x1xf32, #tpu.memory_space<vmem>>, %arg10: memref<1x32x128xf32, #tpu.memory_space<vmem>>) attributes {dimension_semantics = [#tpu.dimension_semantics<parallel>, #tpu.dimension_semantics<parallel>], iteration_bounds = array<i64: 2, 2>, scalar_prefetch = 0 : i64, scratch_operands = 0 : i64, tpu.core_type = #tpu.core_type<tc>, window_params = [{transform_indices = @transform_0, window_bounds = array<i64: 1, 32, 128>}, {transform_indices = @transform_1, window_bounds = array<i64: 1, 32, 1>}, {pipeline_mode = #tpu.pipeline_mode<synchronous>, transform_indices = @transform_2, window_bounds = array<i64: 64, 32>}, {pipeline_mode = #tpu.pipeline_mode<synchronous>, transform_indices = @transform_3, window_bounds = array<i64: 64, 1>}, {pipeline_mode = #tpu.pipeline_mode<synchronous>, transform_indices = @transform_4, window_bounds = array<i64: 64, 1>}, {pipeline_mode = #tpu.pipeline_mode<synchronous>, transform_indices = @transform_5, window_bounds = array<i64: 32, 64>}, {pipeline_mode = #tpu.pipeline_mode<synchronous>, transform_indices = @transform_6, window_bounds = array<i64: 32, 1>}, {pipeline_mode = #tpu.pipeline_mode<synchronous>, transform_indices = @transform_7, window_bounds = array<i64: 32, 1>}, {transform_indices = @transform_8, window_bounds = array<i64: 1, 32, 128>}]} {
    %c0 = arith.constant 0 : index
    %c0_0 = arith.constant 0 : index
    %c0_1 = arith.constant 0 : index
    %0 = vector.load %arg2[%c0, %c0_0, %c0_1] : memref<1x32x128xf32, #tpu.memory_space<vmem>>, vector<1x32x128xf32>
    %1 = vector.shape_cast %0 : vector<1x32x128xf32> to vector<32x128xf32>
    %c0_2 = arith.constant 0 : index
    %c0_3 = arith.constant 0 : index
    %c0_4 = arith.constant 0 : index
    %2 = vector.load %arg3[%c0_2, %c0_3, %c0_4] : memref<1x32x1xf32, #tpu.memory_space<vmem>>, vector<1x32x1xf32>
    %3 = vector.shape_cast %2 : vector<1x32x1xf32> to vector<32x1xf32>
    %4 = vector.broadcast %3 : vector<32x1xf32> to vector<32x128xf32>
    %5 = arith.mulf %1, %4 : vector<32x128xf32>
    %6 = arith.addf %1, %5 : vector<32x128xf32>
    %c0_5 = arith.constant 0 : index
    %c0_6 = arith.constant 0 : index
    %7 = vector.load %arg4[%c0_5, %c0_6] : memref<64x32xf32, #tpu.memory_space<vmem>>, vector<64x32xf32>
    %cst = arith.constant dense<0.000000e+00> : vector<64x128xf32>
    %8 = tpu.matmul %7, %6, %cst {dimension_numbers = #tpu.dot_dimension_numbers<[1], [0], [0], [1], [0, 0, 1, 1], [], []>} : vector<64x32xf32>, vector<32x128xf32>, vector<64x128xf32> -> vector<64x128xf32>
    %c0_7 = arith.constant 0 : index
    %c0_8 = arith.constant 0 : index
    %9 = vector.load %arg5[%c0_7, %c0_8] : memref<64x1xf32, #tpu.memory_space<vmem>>, vector<64x1xf32>
    %10 = vector.broadcast %9 : vector<64x1xf32> to vector<64x128xf32>
    %11 = arith.mulf %8, %10 : vector<64x128xf32>
    %c0_9 = arith.constant 0 : index
    %c0_10 = arith.constant 0 : index
    %12 = vector.load %arg6[%c0_9, %c0_10] : memref<64x1xf32, #tpu.memory_space<vmem>>, vector<64x1xf32>
    %13 = vector.broadcast %12 : vector<64x1xf32> to vector<64x128xf32>
    %14 = arith.addf %11, %13 : vector<64x128xf32>
    %15 = arith.negf %14 : vector<64x128xf32>
    %16 = math.exp %15 : vector<64x128xf32>
    %cst_11 = arith.constant 1.000000e+00 : f32
    %17 = vector.broadcast %cst_11 : f32 to vector<64x128xf32>
    %18 = arith.addf %17, %16 : vector<64x128xf32>
    %19 = arith.divf %17, %18 : vector<64x128xf32>
    %20 = arith.mulf %14, %19 : vector<64x128xf32>
    %c0_12 = arith.constant 0 : index
    %c0_13 = arith.constant 0 : index
    %21 = vector.load %arg7[%c0_12, %c0_13] : memref<32x64xf32, #tpu.memory_space<vmem>>, vector<32x64xf32>
    %cst_14 = arith.constant dense<0.000000e+00> : vector<32x128xf32>
    %22 = tpu.matmul %21, %20, %cst_14 {dimension_numbers = #tpu.dot_dimension_numbers<[1], [0], [0], [1], [0, 0, 1, 1], [], []>} : vector<32x64xf32>, vector<64x128xf32>, vector<32x128xf32> -> vector<32x128xf32>
    %c0_15 = arith.constant 0 : index
    %c0_16 = arith.constant 0 : index
    %23 = vector.load %arg8[%c0_15, %c0_16] : memref<32x1xf32, #tpu.memory_space<vmem>>, vector<32x1xf32>
    %24 = vector.broadcast %23 : vector<32x1xf32> to vector<32x128xf32>
    %25 = arith.mulf %22, %24 : vector<32x128xf32>
    %c0_17 = arith.constant 0 : index
    %c0_18 = arith.constant 0 : index
    %26 = vector.load %arg9[%c0_17, %c0_18] : memref<32x1xf32, #tpu.memory_space<vmem>>, vector<32x1xf32>
    %27 = vector.broadcast %26 : vector<32x1xf32> to vector<32x128xf32>
    %28 = arith.addf %25, %27 : vector<32x128xf32>
    %29 = arith.addf %6, %28 : vector<32x128xf32>
    %c0_19 = arith.constant 0 : index
    %c0_20 = arith.constant 0 : index
    %c0_21 = arith.constant 0 : index
    %30 = vector.load %arg10[%c0_19, %c0_20, %c0_21] : memref<1x32x128xf32, #tpu.memory_space<vmem>>, vector<1x32x128xf32>
    %31 = vector.shape_cast %30 : vector<1x32x128xf32> to vector<32x128xf32>
    %32 = vector.shape_cast %29 : vector<32x128xf32> to vector<1x32x128xf32>
    tpu.vector_store %arg10[%c0_19, %c0_20, %c0_21], %32 {strides = array<i32>} : memref<1x32x128xf32, #tpu.memory_space<vmem>>, vector<1x32x128xf32>,
    return
  }
  func.func @transform_0(%arg0: i32, %arg1: i32) -> (i32, i32, i32) {
    %c0_i32 = arith.constant 0 : i32
    %c0_i32_0 = arith.constant 0 : i32
    return %arg0, %c0_i32, %arg1 : i32, i32, i32
  }
  func.func @transform_1(%arg0: i32, %arg1: i32) -> (i32, i32, i32) {
    %c0_i32 = arith.constant 0 : i32
    %c0_i32_0 = arith.constant 0 : i32
    %c0_i32_1 = arith.constant 0 : i32
    return %arg0, %c0_i32, %c0_i32_0 : i32, i32, i32
  }
  func.func @transform_2(%arg0: i32, %arg1: i32) -> (i32, i32) {
    %c0_i32 = arith.constant 0 : i32
    %c0_i32_0 = arith.constant 0 : i32
    %c0_i32_1 = arith.constant 0 : i32
    return %c0_i32, %c0_i32_0 : i32, i32
  }
  func.func @transform_3(%arg0: i32, %arg1: i32) -> (i32, i32) {
    %c0_i32 = arith.constant 0 : i32
    %c0_i32_0 = arith.constant 0 : i32
    %c0_i32_1 = arith.constant 0 : i32
    return %c0_i32, %c0_i32_0 : i32, i32
  }
  func.func @transform_4(%arg0: i32, %arg1: i32) -> (i32, i32) {
    %c0_i32 = arith.constant 0 : i32
    %c0_i32_0 = arith.constant 0 : i32
    %c0_i32_1 = arith.constant 0 : i32
    return %c0_i32, %c0_i32_0 : i32, i32
  }
  func.func @transform_5(%arg0: i32, %arg1: i32) -> (i32, i32) {
    %c0_i32 = arith.constant 0 : i32
    %c0_i32_0 = arith.constant 0 : i32
    %c0_i32_1 = arith.constant 0 : i32
    return %c0_i32, %c0_i32_0 : i32, i32
  }
  func.func @transform_6(%arg0: i32, %arg1: i32) -> (i32, i32) {
    %c0_i32 = arith.constant 0 : i32
    %c0_i32_0 = arith.constant 0 : i32
    %c0_i32_1 = arith.constant 0 : i32
    return %c0_i32, %c0_i32_0 : i32, i32
  }
  func.func @transform_7(%arg0: i32, %arg1: i32) -> (i32, i32) {
    %c0_i32 = arith.constant 0 : i32
    %c0_i32_0 = arith.constant 0 : i32
    %c0_i32_1 = arith.constant 0 : i32
    return %c0_i32, %c0_i32_0 : i32, i32
  }
  func.func @transform_8(%arg0: i32, %arg1: i32) -> (i32, i32, i32) {
    %c0_i32 = arith.constant 0 : i32
    %c0_i32_0 = arith.constant 0 : i32
    return %arg0, %c0_i32, %arg1 : i32, i32, i32
  }
}

</mosaic_0001>

<bundles_post_ra>
// kernel: simple_psa_block_pallas.2
= control target key start
LH: loop header
LB: loop body
LE: loop exit
PB: predicated region body
PF: predicated region fallthrough
CT: control target
= control target key end

     0   :  { %s444_s6 = smov 0   ;;  %s446_s7 = smov 0   ;;  %s549_s0 = inlined_call_operand.vmem [shape: f32[2,32,256], index: 0, kind: input, shape index: {}]   ;;  %s550_s1 = inlined_call_operand.vmem [shape: f32[2,32,1], index: 1, kind: output, shape index: {}]  }
   0x1   :  { %s448_s8 = smov 0   ;;  %s450_s9 = smov 0  }
   0x2   :  { %s452_s10 = smov 0   ;;  %s454_s11 = smov 0  }
   0x3   :  { %s456_s12 = smov 0  }
   0x4 LB: > { %s20_s13 = sadd.s32 1, %s423_s10  ;;  %s23_s14 = sadd.s32 1, %s427_s11  ;;  %s431_s12 = sphi %s456_s12, %s11_s12   ;;  %s427_s11 = sphi %s454_s11, %s556_s11   ;;  %s423_s10 = sphi %s452_s10, %s555_s10   ;;  %s419_s9 = sphi %s450_s9, %s554_s9   ;;  %s415_s8 = sphi %s448_s8, %s553_s8   ;;  %s411_s7 = sphi %s446_s7, %s552_s7   ;;  %s407_s6 = sphi %s444_s6, %s551_s6  }
   0x5   : > { %p21_p0 = scmp.ge.s32.totalorder %s20_s13, 2  ;;  %p39_p1 = scmp.ne.s32.totalorder %s411_s7, %s407_s6 }
   0x6   : > { %p40_p2 = scmp.eq.s32.totalorder %s431_s12, 0  ;;  %s32_s18 = sadd.s32 1, %s411_s7 }
   0x7   : > { %s558_s13 = smov (%p21_p0, %s20_s13), 0  ;;  %s560_s14 = smov (!%p21_p0, %s23_s14), %s427_s11 }
   0x8   : > { %p41_p3 = por %p40_p2, %p39_p1  ;;  %p25_p4 = scmp.ge.s32.totalorder %s560_s14, 2 }
   0x9   : > { %s28_s15 = ssub.s32 %s423_s10, %s558_s13  ;;  %p307_p6 = scmp.ge.s32.totalorder %s431_s12, 4 }
   0xa   : > { %s562_s14 = smov (%p25_p4, %s560_s14), 0 }
   0xb   : > { %s27_s16 = ssub.s32 %s427_s11, %s562_s14  ;;  %91 = sbr.rel (%p307_p6) target bundleno = 26 (0x1a), region = 16 }
   0xc   : > { %s29_s17 = sor.u32 %s28_s15, %s27_s16 }
   0xd   : > { %p30_p5 = scmp.eq.s32.totalorder %s29_s17, 0 }
   0xf   : > { %s495_s19 = scalar_select %p30_p5, %s411_s7, %s32_s18  }
  0x10   : > { %94 = sbr.rel (!%p41_p3) target bundleno = 26 (0x1a), region = 20  ;;  %s96_s20 = sand.u32 (%p41_p3), 1, %s411_s7  }
  0x11   : > { %s309_s21 = sshll.u32 (%p41_p3), %s427_s11, 3  ;;  %s308_s22 = sshll.u32 (%p41_p3), %s96_s20, 5 }
  0x12   : > { %s100_s23 = sadd.s32 (%p41_p3), %s423_s10, %s309_s21  ;;  %s98_s28 = scalar_lea.vmem (%p41_p3), [#allocation3], %s308_s22 }
  0x13   : > { %s310_s24 = sshll.u32 (%p41_p3), %s100_s23, 3 }
  0x14   : > { %s102_s27 = scalar_lea.vmem (%p41_p3), %s549_s0, %s310_s24 }
  0x15   : > { %v137_v0 = vld [vmem:[%s102_s27] sm:$0xff]  ;;  %v139_v1 = vld [vmem:[%s102_s27 + $0x10] sm:$0xff] }
  0x16   : > { %v141_v2 = vld [vmem:[%s102_s27 + $0x20] sm:$0xff]  ;;  %138 = vst [vmem:[%s98_s28] sm:$0xff] %v137_v0  ;;  %v143_v3 = vld [vmem:[%s102_s27 + $0x30] sm:$0xff] }
  0x17   : > { %140 = vst [vmem:[%s98_s28 + $0x8] sm:$0xff] %v139_v1 }
  0x18   : > { %142 = vst [vmem:[%s98_s28 + $0x10] sm:$0xff] %v141_v2 }
  0x19   : > { %144 = vst [vmem:[%s98_s28 + $0x18] sm:$0xff] %v143_v3 }
  0x1a PF: > { %p311_p7 = scmp.ge.s32.totalorder %s431_s12, 1  ;;  %p149_p8 = scmp.lt.s32.totalorder %s431_s12, 5 }
  0x1c   : > { %p150_p9 = pnand %p311_p7, %p149_p8 }
  0x1d   : > { %s156_s29 = sand.u32 (!%p150_p9), 1, %s407_s6   ;;  %p175_p10 = scmp.lt.s32.totalorder (!%p150_p9), %s419_s9, 1 }
  0x1e   : > { %153 = sbr.rel (%p150_p9) target bundleno = 184 (0xb8), region = 58  ;;  %s312_s30 = sshll.u32 (!%p150_p9), %s156_s29, 5 }
  0x1f   : > { %s158_s15 = scalar_lea.vmem (!%p150_p9), [#allocation3], %s312_s30  ;;  %p315_p11 = scmp.ne.s32.totalorder (!%p150_p9), %s415_s8, 0 }
  0x23   : > { %s564_s9 = smov (!%p175_p10, %s419_s9), 1  ;;  %183 = sbr.rel (%p315_p11) target bundleno = 45 (0x2d), region = 66 }
  0x24   : > { %s319_s2 = sshll.u32 %s564_s9, 5 }
  0x25   : > { %s512_s5 = scalar_lea.vmem %s550_s1, %s319_s2 }
  0x28   : > { %vm184_vm0 = vcmask 7168   ;;  %v433_v4 = vmov 0.0  }
  0x29   : > { %185 = vst.msk [vmem:[#allocation2] sm:$0xff] %vm184_vm0, %v433_v4 }
  0x2a   : > { %186 = vst.msk [vmem:[#allocation2 + $0x8] sm:$0xff] %vm184_vm0, %v433_v4 }
  0x2b   : > { %187 = vst.msk [vmem:[#allocation2 + $0x10] sm:$0xff] %vm184_vm0, %v433_v4 }
  0x2c   : > { %188 = vst.msk [vmem:[#allocation2 + $0x18] sm:$0xff] %vm184_vm0, %v433_v4 }
  0x2d PF: > { %v195_v5 = vld [vmem:[%s158_s15 + $0x10] sm:$0xff]  ;;  %v193_v6 = vld [vmem:[%s158_s15] sm:$0xff]  ;;  %v196_v7 = vld [vmem:[%s158_s15 + $0x18] sm:$0xff]  ;;  %vm209_vm1 = vcmask 7168   ;;  %p316_p12 = scmp.ne.s32.totalorder %s415_s8, 1 }
  0x2e   : > { %201 = vadd.xlane.f32.xlu1 %v195_v5  ;;  %197 = vadd.xlane.f32.xlu0 %v193_v6  ;;  %v194_v8 = vld [vmem:[%s158_s15 + $0x8] sm:$0xff] }
  0x30   : > { %v189_v10 = vld [vmem:[#allocation2] sm:$0xff] }
  0x31   : > { %v190_v16 = vld [vmem:[#allocation2 + $0x8] sm:$0xff] }
  0x32   : > { %v191_v9 = vld [vmem:[#allocation2 + $0x10] sm:$0xff] }
  0x33   : > { %v192_v15 = vld [vmem:[#allocation2 + $0x18] sm:$0xff] }
  0x36   : > { %203 = vadd.xlane.f32.xlu1 %v196_v7  ;;  %199 = vadd.xlane.f32.xlu0 %v194_v8 }
  0xa1   : > { %v202_v11 = vpop.xlane.xlu1 %201  ;;  %v198_v12 = vpop.xlane.xlu0 %197 }
  0xa2   : > { %v207_v13 = vadd.f32 %v202_v11, %v191_v9  ;;  %v205_v14 = vadd.f32 %v198_v12, %v189_v10 }
  0xa4   : > { %212 = vst.msk [vmem:[#allocation2 + $0x10] sm:$0xff] %vm209_vm1, %v207_v13 }
  0xa5   : > { %210 = vst.msk [vmem:[#allocation2] sm:$0xff] %vm209_vm1, %v205_v14 }
  0xa9   : > { %v204_v17 = vpop.xlane.xlu1 %203  ;;  %v200_v18 = vpop.xlane.xlu0 %199  ;;  %217 = sbr.rel (%p316_p12) target bundleno = 184 (0xb8), region = 70 }
  0xaa   : > { %v208_v19 = vadd.f32 %v204_v17, %v192_v15  ;;  %v206_v20 = vadd.f32 %v200_v18, %v190_v16 }
  0xac   : > { %213 = vst.msk [vmem:[#allocation2 + $0x18] sm:$0xff] %vm209_vm1, %v208_v19 }
  0xad   : > { %211 = vst.msk [vmem:[#allocation2 + $0x8] sm:$0xff] %vm209_vm1, %v206_v20 }
  0xae   : > { %v218_v21 = vld [vmem:[#allocation2] sm:$0xff]  ;;  %v220_v23 = vld [vmem:[#allocation2 + $0x10] sm:$0xff] }
  0xaf   : > { %v222_v24 = vmul.f32 0.00390625, %v218_v21  ;;  %v224_v26 = vmul.f32 0.00390625, %v220_v23 }
  0xb1   : > { %226 = vst.msk [vmem:[%s512_s5] sm:$0xff] %vm209_vm1, %v222_v24 }
  0xb2   : > { %228 = vst.msk [vmem:[%s512_s5 + $0x10] sm:$0xff] %vm209_vm1, %v224_v26 }
  0xb3   : > { %v221_v27 = vld [vmem:[#allocation2 + $0x18] sm:$0xff] }
  0xb4   : > { %v219_v22 = vld [vmem:[#allocation2 + $0x8] sm:$0xff]  ;;  %v225_v28 = vmul.f32 0.00390625, %v221_v27 }
  0xb5   : > { %v223_v25 = vmul.f32 0.00390625, %v219_v22 }
  0xb6   : > { %229 = vst.msk [vmem:[%s512_s5 + $0x18] sm:$0xff] %vm209_vm1, %v225_v28 }
  0xb7   : > { %227 = vst.msk [vmem:[%s512_s5 + $0x8] sm:$0xff] %vm209_vm1, %v223_v25 }
  0xb8 PF: > { %s11_s12 = sadd.s32 1, %s431_s12   ;;  %s551_s6 = smov %s411_s7 }
  0xb9   : > { %p8_p13 = scmp.ge.s32.totalorder %s11_s12, 6   ;;  %s552_s7 = smov %s495_s19 }
  0xba   : > { %s553_s8 = smov %s423_s10  ;;  %s554_s9 = smov %s427_s11 }
  0xbb   : > { %s555_s10 = smov %s558_s13  ;;  %s556_s11 = smov %s562_s14 }
  0xbc   :  { %10 = sbr.rel (!%p8_p13) target bundleno = 4 (0x4), region = 105 }

// kernel: simple_psa_block_pallas.3
= control target key start
LH: loop header
LB: loop body
LE: loop exit
PB: predicated region body
PF: predicated region fallthrough
CT: control target
= control target key end

     0   :  { %s1261_s27 = smov 0   ;;  %s1263_s28 = smov 0   ;;  %s1707_s0 = inlined_call_operand.vmem [shape: f32[2,32,256], index: 0, kind: input, shape index: {}]   ;;  %s1708_s1 = inlined_call_operand.vmem [shape: f32[2,32,1], index: 1, kind: input, shape index: {}]   ;;  %s1709_s2 = inlined_call_operand.vmem [shape: f32[64,32], index: 2, kind: input, shape index: {}]   ;;  %s1710_s3 = inlined_call_operand.vmem [shape: f32[64,1], index: 3, kind: input, shape index: {}]   ;;  %s1711_s4 = inlined_call_operand.vmem [shape: f32[64,1], index: 4, kind: input, shape index: {}]   ;;  %s1712_s5 = inlined_call_operand.vmem [shape: f32[32,64], index: 5, kind: input, shape index: {}]   ;;  %s1713_s6 = inlined_call_operand.vmem [shape: f32[32,1], index: 6, kind: input, shape index: {}]   ;;  %s1714_s7 = inlined_call_operand.vmem [shape: f32[32,1], index: 7, kind: input, shape index: {}]   ;;  %s1715_s8 = inlined_call_operand.vmem [shape: f32[2,32,256], index: 8, kind: output, shape index: {}]  }
   0x1   :  { %s1265_s29 = smov 0   ;;  %s1267_s30 = smov 0  }
   0x2   :  { %s1269_s9 = smov 0   ;;  %s1271_s10 = smov 0  }
   0x3   :  { %s1273_s11 = smov 0  }
   0x4 LB: > { %s27_s12 = sadd.s32 1, %s1205_s9  ;;  %s30_s13 = sadd.s32 1, %s1209_s10  ;;  %s1213_s11 = sphi %s1273_s11, %s18_s11   ;;  %s1209_s10 = sphi %s1271_s10, %s1738_s10   ;;  %s1205_s9 = sphi %s1269_s9, %s1737_s9   ;;  %s1201_s30 = sphi %s1267_s30, %s1736_s30   ;;  %s1197_s29 = sphi %s1265_s29, %s1735_s29   ;;  %s1193_s28 = sphi %s1263_s28, %s1734_s28   ;;  %s1189_s27 = sphi %s1261_s27, %s1733_s27  }
   0x5   : > { %p28_p0 = scmp.ge.s32.totalorder %s27_s12, 2  ;;  %s1017_s14 = sadd.s32 4294967295, %s1213_s11  }
   0x6   : > { %p46_p1 = scmp.ne.s32.totalorder %s1193_s28, %s1189_s27  ;;  %p47_p2 = scmp.eq.s32.totalorder %s1213_s11, 0 }
   0x7   : > { %s1740_s12 = smov (%p28_p0, %s27_s12), 0  ;;  %s1742_s13 = smov (!%p28_p0, %s30_s13), %s1209_s10 }
   0x8   : > { %p32_p3 = scmp.ge.s32.totalorder %s1742_s13, 2  ;;  %p230_p4 = scmp.eq.s32.totalorder %s1017_s14, 3 }
   0x9   : > { %s35_s15 = ssub.s32 %s1205_s9, %s1740_s12  ;;  %p48_p5 = por %p47_p2, %p46_p1 }
   0xa   : > { %s1744_s13 = smov (%p32_p3, %s1742_s13), 0  ;;  %p1309_p6 = por %p230_p4, %p46_p1 }
   0xb   : > { %s34_s17 = ssub.s32 %s1209_s10, %s1744_s13  ;;  %s39_s19 = sadd.s32 1, %s1193_s28 }
   0xc   : > { %s36_s18 = sor.u32 %s35_s15, %s34_s17  ;;  %p1020_p8 = scmp.ge.s32.totalorder %s1213_s11, 4 }
   0xd   : > { %p37_p7 = scmp.eq.s32.totalorder %s36_s18, 0 }
   0xe   : > { %270 = sbr.rel (%p1020_p8) target bundleno = 29 (0x1d), region = 40 }
   0xf   : > { %s1317_s20 = scalar_select %p37_p7, %s1193_s28, %s39_s19  }
  0x13   : > { %273 = sbr.rel (!%p48_p5) target bundleno = 29 (0x1d), region = 44  ;;  %s275_s21 = sand.u32 (%p48_p5), 1, %s1193_s28  }
  0x14   : > { %s1022_s22 = sshll.u32 (%p48_p5), %s1209_s10, 3  ;;  %s1021_s23 = sshll.u32 (%p48_p5), %s275_s21, 5 }
  0x15   : > { %s279_s24 = sadd.s32 (%p48_p5), %s1205_s9, %s1022_s22  ;;  %s277_s17 = scalar_lea.vmem (%p48_p5), [#allocation2], %s1021_s23 }
  0x16   : > { %s1023_s25 = sshll.u32 (%p48_p5), %s279_s24, 3 }
  0x17   : > { %s281_s15 = scalar_lea.vmem (%p48_p5), %s1707_s0, %s1023_s25 }
  0x18   : > { %v316_v0 = vld [vmem:[%s281_s15] sm:$0xff]  ;;  %v318_v1 = vld [vmem:[%s281_s15 + $0x10] sm:$0xff] }
  0x19   : > { %v320_v2 = vld [vmem:[%s281_s15 + $0x20] sm:$0xff]  ;;  %317 = vst [vmem:[%s277_s17] sm:$0xff] %v316_v0  ;;  %v322_v3 = vld [vmem:[%s281_s15 + $0x30] sm:$0xff] }
  0x1a   : > { %319 = vst [vmem:[%s277_s17 + $0x8] sm:$0xff] %v318_v1 }
  0x1b   : > { %321 = vst [vmem:[%s277_s17 + $0x10] sm:$0xff] %v320_v2 }
  0x1c   : > { %323 = vst [vmem:[%s277_s17 + $0x18] sm:$0xff] %v322_v3 }
  0x1d PF: > { %p1024_p9 = scmp.ge.s32.totalorder %s1213_s11, 1  ;;  %p336_p10 = scmp.lt.s32.totalorder %s1213_s11, 5 }
  0x1f   : > { %p337_p11 = pnand %p1024_p9, %p336_p10 }
  0x20   : > { %p380_p12 = scmp.lt.s32.totalorder (!%p337_p11), %s1201_s30, 1  ;;  %s343_s14 = sand.u32 (!%p337_p11), 1, %s1189_s27  }
  0x21   : > { %340 = sbr.rel (%p337_p11) target bundleno = 551 (0x227), region = 86  ;;  %s1388_s15 = sshll.u32 (!%p337_p11), %s343_s14, 5 }
  0x22   : > { %s379_s22 = scalar_lea.vmem (!%p337_p11), [#allocation3], %s1388_s15 }
  0x26   : > { %v1215_v4 = vmov 0   ;;  %s381_s18 = scalar_select %p380_p12, %s1201_s30, 1  ;;  %v558_v9 = vld [vmem:[%s1711_s4 + $0x38] sm:$0xff]  ;;  %v500_v10 = vld [vmem:[%s1710_s3 + $0x28] sm:$0xff]  ;;  %v499_v11 = vld [vmem:[%s1710_s3 + $0x20] sm:$0xff]  ;;  %vm429_vm0 = vcmask 261120  }
  0x27   : > { %1125 = vset.pattern.permute.xlu1 %v1215_v4  ;;  %1124 = vset.pattern.permute.xlu0 %v1215_v4  ;;  %v556_v12 = vld [vmem:[%s1711_s4 + $0x28] sm:$0xff]  ;;  %v555_v13 = vld [vmem:[%s1711_s4 + $0x20] sm:$0xff]  ;;  %v497_v14 = vld [vmem:[%s1710_s3 + $0x10] sm:$0xff] }
  0x28   : > { %1126 = vset.pattern.permute.xlu2 %v1215_v4  ;;  %s1054_s19 = sshll.u32 %s381_s18, 5  ;;  %v496_v15 = vld [vmem:[%s1710_s3 + $0x8] sm:$0xff]  ;;  %v553_v16 = vld [vmem:[%s1711_s4 + $0x10] sm:$0xff]  ;;  %v551_v18 = vld [vmem:[%s1711_s4] sm:$0xff] }
  0x29   : > { %s384_s23 = scalar_lea.vmem %s1708_s1, %s1054_s19  ;;  %v552_v17 = vld [vmem:[%s1711_s4 + $0x8] sm:$0xff]  ;;  %v815_v20 = vld [vmem:[%s1713_s6 + $0x10] sm:$0xff]  ;;  %v841_v21 = vld [vmem:[%s1714_s7] sm:$0xff]  ;;  %s345_s19 = scalar_lea.vmem [#allocation2], %s1388_s15 }
  0x2a   : > { %v392_v5 = vld [vmem:[%s384_s23 + $0x18] sm:$0xff]  ;;  %v390_v6 = vld [vmem:[%s384_s23 + $0x8] sm:$0xff]  ;;  %v391_v7 = vld [vmem:[%s384_s23 + $0x10] sm:$0xff]  ;;  %s1050_s15 = sshll.u32 (%p1309_p6), %s1201_s30, 3 }
  0x2b   : > { %410 = vperm.xlu0 %1124, %v392_v5   ;;  %400 = vperm.xlu1 %1125, %v390_v6   ;;  %v389_v8 = vld [vmem:[%s384_s23] sm:$0xff]  ;;  %v814_v19 = vld [vmem:[%s1713_s6 + $0x8] sm:$0xff]  ;;  %v844_v23 = vld [vmem:[%s1714_s7 + $0x18] sm:$0xff]  ;;  %s885_s27 = sadd.s32 (%p1309_p6), %s1197_s29, %s1050_s15 }
  0x2c   : > { %v842_v22 = vld [vmem:[%s1714_s7 + $0x8] sm:$0xff]  ;;  %v502_v24 = vld [vmem:[%s1710_s3 + $0x38] sm:$0xff]  ;;  %v501_v25 = vld [vmem:[%s1710_s3 + $0x30] sm:$0xff]  ;;  %s1051_s23 = sshll.u32 (%p1309_p6), %s885_s27, 3 }
  0x2d   : > { %540 = vperm.xlu2 %1126, %v502_v24   ;;  %v557_v26 = vld [vmem:[%s1711_s4 + $0x30] sm:$0xff]  ;;  %v498_v27 = vld [vmem:[%s1710_s3 + $0x18] sm:$0xff]  ;;  %v386_v34 = vld [vmem:[%s345_s19 + $0x8] sm:$0xff]  ;;  %s887_s26 = scalar_lea.vmem (%p1309_p6), %s1715_s8, %s1051_s23 }
  0x2e   : > { %v388_v28 = vld [vmem:[%s345_s19 + $0x18] sm:$0xff]  ;;  %v387_v35 = vld [vmem:[%s345_s19 + $0x10] sm:$0xff]  ;;  %v385_v38 = vld [vmem:[%s345_s19] sm:$0xff] }
  0x2f   : > { %v554_v31 = vld [vmem:[%s1711_s4 + $0x18] sm:$0xff]  ;;  %v495_v39 = vld [vmem:[%s1710_s3] sm:$0xff]  ;;  %v422_v49 = vld [vmem:[%s1709_s2 + $0x8] sm:$0xff] }
  0x30   : > { %v421_v46 = vld [vmem:[%s1709_s2] sm:$0xff]  ;;  %v424_v47 = vld [vmem:[%s1709_s2 + $0x18] sm:$0xff]  ;;  %v423_v52 = vld [vmem:[%s1709_s2 + $0x10] sm:$0xff] }
  0x31   : > { %v813_v48 = vld [vmem:[%s1713_s6] sm:$0xff]  ;;  %v816_v51 = vld [vmem:[%s1713_s6 + $0x18] sm:$0xff]  ;;  %v426_v53 = vld [vmem:[%s1709_s2 + $0x28] sm:$0xff] }
  0x32   : > { %v425_v50 = vld [vmem:[%s1709_s2 + $0x20] sm:$0xff]  ;;  %v843_v54 = vld [vmem:[%s1714_s7 + $0x10] sm:$0xff]  ;;  %v428_v56 = vld [vmem:[%s1709_s2 + $0x38] sm:$0xff] }
  0x33   : > { %405 = vperm.xlu0 %1124, %v391_v7   ;;  %395 = vperm.xlu1 %1125, %v389_v8   ;;  %v427_v55 = vld [vmem:[%s1709_s2 + $0x30] sm:$0xff] }
  0x35   : > { %535 = vperm.xlu2 %1126, %v501_v25  }
  0x3b   : > { %596 = vperm.xlu0 %1124, %v558_v9   ;;  %530 = vperm.xlu1 %1125, %v500_v10  }
  0x3d   : > { %591 = vperm.xlu2 %1126, %v557_v26  }
  0x43   : > { %525 = vperm.xlu0 %1124, %v499_v11   ;;  %586 = vperm.xlu1 %1125, %v556_v12  }
  0x45   : > { %520 = vperm.xlu2 %1126, %v498_v27  }
  0x4b   : > { %581 = vperm.xlu0 %1124, %v555_v13   ;;  %515 = vperm.xlu1 %1125, %v497_v14  }
  0x4d   : > { %576 = vperm.xlu2 %1126, %v554_v31  }
  0x53   : > { %510 = vperm.xlu0 %1124, %v496_v15   ;;  %571 = vperm.xlu1 %1125, %v553_v16  }
  0x55   : > { %505 = vperm.xlu2 %1126, %v495_v39  }
  0x5b   : > { %566 = vperm.xlu0 %1124, %v552_v17   ;;  %561 = vperm.xlu1 %1125, %v551_v18  }
  0x5d   : > { %819 = vperm.xlu2 %1126, %v813_v48  }
  0x63   : > { %824 = vperm.xlu0 %1124, %v814_v19   ;;  %829 = vperm.xlu1 %1125, %v815_v20  }
  0x65   : > { %834 = vperm.xlu2 %1126, %v816_v51  }
  0x6b   : > { %847 = vperm.xlu0 %1124, %v841_v21   ;;  %852 = vperm.xlu1 %1125, %v842_v22  }
  0x6d   : > { %857 = vperm.xlu2 %1126, %v843_v54  }
  0x73   : > { %862 = vperm.xlu0 %1124, %v844_v23  }
  0x87   : > { %v541_v57 = vpop.permute.xlu2 %540 }
  0x8f   : > { %v536_v58 = vpop.permute.xlu2 %535 }
  0x97   : > { %v592_v60 = vpop.permute.xlu2 %591 }
  0x9d   : > { %v411_v29 = vpop.permute.xlu0 %410  ;;  %v401_v30 = vpop.permute.xlu1 %400 }
  0x9e   : > { %v416_v32 = vmul.f32 %v411_v29, %v388_v28  ;;  %v414_v40 = vmul.f32 %v401_v30, %v386_v34 }
  0x9f   : > { %v521_v63 = vpop.permute.xlu2 %520 }
  0xa0   : > { %v1397_v33 = vadd.f32 %v416_v32, %v388_v28  ;;  %v1406_v44 = vadd.f32 %v414_v40, %v386_v34 }
  0xa2   : > { %466 = vmatpush.msra.mxu0 %v1397_v33  ;;  %1055 = vmatpush.msra.mxu2 %v1397_v33 }
  0xa5   : > { %v406_v36 = vpop.permute.xlu0 %405  ;;  %v396_v37 = vpop.permute.xlu1 %395 }
  0xa6   : > { %v415_v41 = vmul.f32 %v406_v36, %v387_v35  ;;  %v413_v43 = vmul.f32 %v396_v37, %v385_v38 }
  0xa7   : > { %v577_v3 = vpop.permute.xlu2 %576 }
  0xa8   : > { %v1404_v42 = vadd.f32 %v415_v41, %v387_v35  ;;  %v1410_v45 = vadd.f32 %v413_v43, %v385_v38 }
  0xaa   : > { %467 = vmatpush.msra.mxu0 %v1404_v42  ;;  %1056 = vmatpush.msra.mxu2 %v1404_v42 }
  0xac   : > { %468 = vmatpush.msra.mxu0 %v1406_v44  ;;  %1057 = vmatpush.msra.mxu2 %v1406_v44 }
  0xad   : > { %v531_v59 = vpop.permute.xlu1 %530  ;;  %v597_v61 = vpop.permute.xlu0 %596 }
  0xae   : > { %469 = vmatpush.msra.mxu0 %v1410_v45  ;;  %1058 = vmatpush.msra.mxu2 %v1410_v45 }
  0xaf   : > { %1029 = vmatmul.msk.f32.vlgmr.msra.gmra.mxu0 %vm429_vm0, %v421_v46  ;;  %1032 = vmatmul.msk.f32.vlgmr.msra.gmra.mxu2 %vm429_vm0, %v424_v47  ;;  %v506_v9 = vpop.permute.xlu2 %505 }
  0xb5   : > { %v587_v62 = vpop.permute.xlu1 %586  ;;  %v526_v0 = vpop.permute.xlu0 %525 }
  0xb7   : > { %1030 = vmatmul.msk.f32.gmra.mxu0 %vm429_vm0, %v422_v49  ;;  %1033 = vmatmul.msk.f32.gmra.mxu2 %vm429_vm0, %v425_v50 }
  0xbd   : > { %v516_v1 = vpop.permute.xlu1 %515  ;;  %v582_v4 = vpop.permute.xlu0 %581 }
  0xbf   : > { %1031 = vmatmul.msk.f32.gmra.mxu0 %vm429_vm0, %v423_v52  ;;  %1034 = vmatmul.msk.f32.gmra.mxu2 %vm429_vm0, %v426_v53 }
  0xc5   : > { %v572_v6 = vpop.permute.xlu1 %571  ;;  %v511_v10 = vpop.permute.xlu0 %510 }
  0xc7   : > { %1035 = vmatmul.msk.f32.gmra.mxu2 %vm429_vm0, %v427_v55 }
  0xcd   : > { %v562_v14 = vpop.permute.xlu1 %561  ;;  %v567_v26 = vpop.permute.xlu0 %566 }
  0xcf   : > { %1036 = vmatmul.msk.f32.gmra.mxu2 %vm429_vm0, %v428_v56 }
 0x12c   : > { %v471_v2 = vpop.f32.mrf.mxu0 }
 0x12d   : > { %v543_v11 = vmul.f32 %v506_v9, %v471_v2 }
 0x12f   : > { %v1457_v15 = vadd.f32 %v562_v14, %v543_v11 }
 0x131   : > { %v1037_v22 = vmul.f32 -1.442695, %v1457_v15 }
 0x132   : > { %v480_v5 = vpop.f32.mrf.mxu2 }
 0x133   : > { %v546_v12 = vmul.f32 %v521_v63, %v480_v5  ;;  %1127 = vpow2.f32 %v1037_v22 }
 0x134   : > { %v474_v7 = vpop.f32.mrf.mxu0 }
 0x135   : > { %v1459_v16 = vadd.f32 %v577_v3, %v546_v12  ;;  %v544_v20 = vmul.f32 %v511_v10, %v474_v7 }
 0x137   : > { %v1040_v24 = vmul.f32 -1.442695, %v1459_v16  ;;  %v1468_v28 = vadd.f32 %v567_v26, %v544_v20 }
 0x139   : > { %1129 = vpow2.f32 %v1040_v24  ;;  %v1038_v32 = vmul.f32 -1.442695, %v1468_v28  ;;  %v1128_v37 = vpop.eup %1127 }
 0x13a   : > { %v483_v8 = vpop.f32.mrf.mxu2  ;;  %v1478_v43 = vadd.f32 1.0, %v1128_v37 }
 0x13b   : > { %v547_v13 = vmul.f32 %v526_v0, %v483_v8 }
 0x13c   : > { %v477_v17 = vpop.f32.mrf.mxu0 }
 0x13d   : > { %v1461_v18 = vadd.f32 %v582_v4, %v547_v13  ;;  %v545_v23 = vmul.f32 %v516_v1, %v477_v17 }
 0x13f   : > { %v1041_v27 = vmul.f32 -1.442695, %v1461_v18  ;;  %v1471_v30 = vadd.f32 %v572_v6, %v545_v23  ;;  %v1130_v38 = vpop.eup %1129 }
 0x140   : > { %v1480_v46 = vadd.f32 1.0, %v1130_v38 }
 0x141   : > { %1131 = vpow2.f32 %v1041_v27  ;;  %v1039_v35 = vmul.f32 -1.442695, %v1471_v30 }
 0x142   : > { %v486_v19 = vpop.f32.mrf.mxu2  ;;  %v693_v22 = vand.u32 2147483647, %v1480_v46  ;;  %v695_v23 = vand.u32 2147483648, %v1480_v46  ;;  %vm689_vm6 = vweird.f32 %v1480_v46 }
 0x143   : > { %v548_v21 = vmul.f32 %v531_v59, %v486_v19 }
 0x144   : > { %vm1581_vm15 = vcmp.eq.f32.partialorder %v693_v22, 8.507059e+37 }
 0x145   : > { %v1465_v25 = vadd.f32 %v587_v62, %v548_v21 }
 0x147   : > { %v1042_v29 = vmul.f32 -1.442695, %v1465_v25  ;;  %v1132_v40 = vpop.eup %1131 }
 0x148   : > { %v1482_v48 = vadd.f32 1.0, %v1132_v40 }
 0x149   : > { %1133 = vpow2.f32 %v1042_v29 }
 0x14a   : > { %v489_v31 = vpop.f32.mrf.mxu2  ;;  %1135 = vpow2.f32 %v1038_v32  ;;  %v708_v21 = vand.u32 2147483647, %v1482_v48  ;;  %vm704_vm1 = vweird.f32 %v1482_v48  ;;  %v710_v29 = vand.u32 2147483648, %v1482_v48 }
 0x14b   : > { %v549_v34 = vmul.f32 %v536_v58, %v489_v31  ;;  %1137 = vpow2.f32 %v1039_v35 }
 0x14c   : > { %vm1558_vm9 = vcmp.eq.f32.partialorder %v708_v21, 8.507059e+37  ;;  %v711_v22 = vor.u32 1.1754944e-38, %v710_v29 }
 0x14d   : > { %v1475_v36 = vadd.f32 %v592_v60, %v549_v34 }
 0x14f   : > { %v1043_v39 = vmul.f32 -1.442695, %v1475_v36  ;;  %v1134_v41 = vpop.eup %1133 }
 0x150   : > { %v1484_v50 = vadd.f32 1.0, %v1134_v41  ;;  %v1136_v51 = vpop.eup %1135 }
 0x151   : > { %1139 = vpow2.f32 %v1043_v39  ;;  %v1138_v53 = vpop.eup %1137  ;;  %v1492_v56 = vadd.f32 1.0, %v1136_v51 }
 0x152   : > { %v492_v47 = vpop.f32.mrf.mxu2  ;;  %1141 = vrcp.f32 %v1478_v43  ;;  %v1497_v58 = vadd.f32 1.0, %v1138_v53  ;;  %vm719_vm12 = vweird.f32 %v1484_v50 }
 0x153   : > { %v550_v49 = vmul.f32 %v541_v57, %v492_v47  ;;  %1143 = vrcp.f32 %v1480_v46  ;;  %vm659_vm0 = vweird.f32 %v1492_v56 }
 0x154   : > { %1145 = vrcp.f32 %v1482_v48  ;;  %vm674_vm10 = vweird.f32 %v1497_v58 }
 0x155   : > { %v1487_v52 = vadd.f32 %v597_v61, %v550_v49  ;;  %1147 = vrcp.f32 %v1484_v50 }
 0x157   : > { %v1140_v54 = vpop.eup %1139  ;;  %v1044_v55 = vmul.f32 -1.442695, %v1487_v52 }
 0x158   : > { %v1495_v57 = vadd.f32 1.0, %v1140_v54  ;;  %v1500_v59 = vpop.eup %1141  ;;  %v820_v54 = vpop.permute.xlu2 %819 }
 0x159   : > { %1149 = vpow2.f32 %v1044_v55  ;;  %v1502_v60 = vpop.eup %1143  ;;  %v640_v2 = vmul.f32 %v1500_v59, %v1478_v43  ;;  %v723_v55 = vand.u32 2147483647, %v1484_v50 }
 0x15a   : > { %1151 = vrcp.f32 %v1495_v57  ;;  %v1505_v61 = vpop.eup %1145  ;;  %v685_v5 = vmul.f32 %v1502_v60, %v1480_v46  ;;  %vm690_vm2 = vweird.f32 %v1502_v60  ;;  %vm734_vm7 = vweird.f32 %v1495_v57 }
 0x15b   : > { %1153 = vrcp.f32 %v1492_v56  ;;  %v1508_v62 = vpop.eup %1147  ;;  %v700_v7 = vmul.f32 %v1505_v61, %v1482_v48  ;;  %v641_v10 = vsub.f32 1.0, %v640_v2  ;;  %vm705_vm3 = vweird.f32 %v1505_v61 }
 0x15c   : > { %1155 = vrcp.f32 %v1497_v58  ;;  %v715_v4 = vmul.f32 %v1508_v62, %v1484_v50  ;;  %v686_v12 = vsub.f32 1.0, %v685_v5  ;;  %vm720_vm5 = vweird.f32 %v1508_v62 }
 0x15d   : > { %v701_v13 = vsub.f32 1.0, %v700_v7  ;;  %v1538_v24 = vmul.f32 %v1500_v59, %v641_v10  ;;  %v738_v40 = vand.u32 2147483647, %v1495_v57  ;;  %v740_v41 = vand.u32 2147483648, %v1495_v57  ;;  %vm1577_vm14 = vmor %vm719_vm12, %vm720_vm5 }
 0x15e   : > { %v716_v11 = vsub.f32 1.0, %v715_v4  ;;  %v687_v31 = vmul.f32 %v1502_v60, %v686_v12 }
 0x15f   : > { %v1150_v63 = vpop.eup %1149  ;;  %v702_v32 = vmul.f32 %v1505_v61, %v701_v13  ;;  %v741_v7 = vor.u32 1.1754944e-38, %v740_v41  ;;  %v643_v46 = vadd.f32 %v1500_v59, %v1538_v24 }
 0x160   : > { %v1510_v0 = vpop.eup %1151  ;;  %v1512_v1 = vadd.f32 1.0, %v1150_v63  ;;  %v717_v27 = vmul.f32 %v1508_v62, %v716_v11  ;;  %v835_v5 = vpop.permute.xlu2 %834 }
 0x161   : > { %v730_v3 = vmul.f32 %v1510_v0, %v1495_v57  ;;  %v1522_v6 = vpop.eup %1153  ;;  %vm735_vm4 = vweird.f32 %v1510_v0  ;;  %v725_v57 = vand.u32 2147483648, %v1484_v50  ;;  %v703_v63 = vadd.f32 %v1505_v61, %v702_v32 }
 0x162   : > { %1157 = vrcp.f32 %v1512_v1  ;;  %v1527_v8 = vpop.eup %1155  ;;  %v655_v17 = vmul.f32 %v1522_v6, %v1492_v56  ;;  %v755_v39 = vand.u32 2147483648, %v1512_v1  ;;  %v753_v49 = vand.u32 2147483647, %v1512_v1  ;;  %vm1563_vm11 = vmor %vm734_vm7, %vm735_vm4 }
 0x163   : > { %v731_v9 = vsub.f32 1.0, %v730_v3  ;;  %v670_v14 = vmul.f32 %v1527_v8, %v1497_v58  ;;  %v718_v51 = vadd.f32 %v1508_v62, %v717_v27  ;;  %vm749_vm13 = vweird.f32 %v1512_v1 }
 0x164   : > { %v656_v35 = vsub.f32 1.0, %v655_v17  ;;  %vm754_vm5 = vcmp.eq.f32.partialorder %v753_v49, 8.507059e+37  ;;  %vm739_vm7 = vcmp.eq.f32.partialorder %v738_v40, 8.507059e+37  ;;  %vm675_vm12 = vweird.f32 %v1527_v8 }
 0x165   : > { %v732_v19 = vmul.f32 %v1510_v0, %v731_v9  ;;  %v671_v34 = vsub.f32 1.0, %v670_v14  ;;  %v722_v11 = vsel %vm1577_vm14, %v1508_v62, %v718_v51  ;;  %v726_v14 = vor.u32 1.1754944e-38, %v725_v57 }
 0x166   : > { %v657_v9 = vmul.f32 %v1522_v6, %v656_v35  ;;  %v696_v32 = vor.u32 1.1754944e-38, %v695_v23 }
 0x167   : > { %v733_v38 = vadd.f32 %v1510_v0, %v732_v19  ;;  %v672_v50 = vmul.f32 %v1527_v8, %v671_v34 }
 0x168   : > { %v1158_v20 = vpop.eup %1157  ;;  %v658_v29 = vadd.f32 %v1522_v6, %v657_v9 }
 0x169   : > { %v745_v26 = vmul.f32 %v1158_v20, %v1512_v1  ;;  %vm750_vm8 = vweird.f32 %v1158_v20  ;;  %v737_v3 = vsel %vm1563_vm11, %v1510_v0, %v733_v38  ;;  %v756_v1 = vor.u32 1.1754944e-38, %v755_v39 }
 0x16a   : > { %vm751_vm4 = vmor %vm749_vm13, %vm750_vm8  ;;  %v688_v0 = vadd.f32 %v1502_v60, %v687_v31  ;;  %v742_v13 = vsel %vm739_vm7, %v741_v7, %v737_v3  ;;  %vm724_vm11 = vcmp.eq.f32.partialorder %v723_v55, 8.507059e+37  ;;  %v673_v62 = vadd.f32 %v1527_v8, %v672_v50  ;;  %v830_v55 = vpop.permute.xlu1 %829 }
 0x16b   : > { %v746_v37 = vsub.f32 1.0, %v745_v26  ;;  %vm1597_vm8 = vmor %vm704_vm1, %vm705_vm3  ;;  %v727_v21 = vsel %vm724_vm11, %v726_v14, %v722_v11  ;;  %v680_v26 = vand.u32 2147483648, %v1497_v58  ;;  %vm660_vm3 = vweird.f32 %v1522_v6 }
 0x16c   : > { %vm1611_vm1 = vmor %vm689_vm6, %vm690_vm2  ;;  %v764_v35 = vmul.f32 %v727_v21, %v1465_v25  ;;  %vm645_vm6 = vweird.f32 %v1500_v59  ;;  %v650_v25 = vand.u32 2147483648, %v1478_v43  ;;  %v648_v39 = vand.u32 2147483647, %v1478_v43 }
 0x16d   : > { %v747_v47 = vmul.f32 %v1158_v20, %v746_v37  ;;  %v692_v27 = vsel %vm1611_vm1, %v1502_v60, %v688_v0  ;;  %vm1629_vm2 = vmor %vm674_vm10, %vm675_vm12  ;;  %v665_v60 = vand.u32 2147483648, %v1492_v56  ;;  %v681_v23 = vor.u32 1.1754944e-38, %v680_v26 }
 0x16e   : > { %v677_v37 = vsel %vm1629_vm2, %v1527_v8, %v673_v62  ;;  %vm644_vm10 = vweird.f32 %v1478_v43  ;;  %v651_v51 = vor.u32 1.1754944e-38, %v650_v25 }
 0x16f   : > { %v748_v2 = vadd.f32 %v1158_v20, %v747_v47  ;;  %v666_v40 = vor.u32 1.1754944e-38, %v665_v60  ;;  %vm646_vm14 = vmor %vm644_vm10, %vm645_vm6 }
 0x170   : > { %v647_v47 = vsel %vm646_vm14, %v1500_v59, %v643_v46  ;;  %v768_v59 = vld [vmem:[%s1712_s5 + $0x8] sm:$0xff] }
 0x171   : > { %v752_v10 = vsel %vm751_vm4, %v1158_v20, %v748_v2  ;;  %v707_v20 = vsel %vm1597_vm8, %v1505_v61, %v703_v63  ;;  %v765_v61 = vmul.f32 %v742_v13, %v1475_v36  ;;  %v663_v36 = vand.u32 2147483647, %v1492_v56 }
 0x172   : > { %v757_v12 = vsel %vm754_vm5, %v756_v1, %v752_v10  ;;  %v712_v31 = vsel %vm1558_vm9, %v711_v22, %v707_v20  ;;  %vm1646_vm9 = vmor %vm659_vm0, %vm660_vm3  ;;  %vm649_vm0 = vcmp.eq.f32.partialorder %v648_v39, 8.507059e+37  ;;  %vm771_vm4 = vcmask 523264   ;;  %v853_v7 = vpop.permute.xlu1 %852 }
 0x173   : > { %v766_v19 = vmul.f32 %v757_v12, %v1487_v52  ;;  %v678_v52 = vand.u32 2147483647, %v1497_v58  ;;  %v697_v58 = vsel %vm1581_vm15, %v696_v32, %v692_v27  ;;  %v763_v8 = vmul.f32 %v712_v31, %v1461_v18  ;;  %v858_v12 = vpop.permute.xlu2 %857 }
 0x174   : > { %v662_v24 = vsel %vm1646_vm9, %v1522_v6, %v658_v29  ;;  %v762_v41 = vmul.f32 %v697_v58, %v1459_v16  ;;  %vm664_vm15 = vcmp.eq.f32.partialorder %v663_v36, 8.507059e+37  ;;  %v652_v6 = vsel %vm649_vm0, %v651_v51, %v647_v47  ;;  %v767_v16 = vld [vmem:[%s1712_s5] sm:$0xff] }
 0x175   : > { %792 = vmatpush.msra.mxu1 %v766_v19  ;;  %1059 = vmatpush.msra.mxu3 %v766_v19  ;;  %vm679_vm13 = vcmp.eq.f32.partialorder %v678_v52, 8.507059e+37  ;;  %v667_v49 = vsel %vm664_vm15, %v666_v40, %v662_v24  ;;  %v759_v53 = vmul.f32 %v652_v6, %v1457_v15  ;;  %v770_v15 = vld [vmem:[%s1712_s5 + $0x18] sm:$0xff] }
 0x176   : > { %v682_v56 = vsel %vm679_vm13, %v681_v23, %v677_v37  ;;  %v760_v43 = vmul.f32 %v667_v49, %v1468_v28  ;;  %v769_v28 = vld [vmem:[%s1712_s5 + $0x10] sm:$0xff] }
 0x177   : > { %793 = vmatpush.msra.mxu1 %v765_v61  ;;  %1060 = vmatpush.msra.mxu3 %v765_v61  ;;  %v761_v18 = vmul.f32 %v682_v56, %v1471_v30  ;;  %v825_v30 = vpop.permute.xlu0 %824 }
 0x179   : > { %794 = vmatpush.msra.mxu1 %v764_v35  ;;  %1061 = vmatpush.msra.mxu3 %v764_v35 }
 0x17b   : > { %795 = vmatpush.msra.mxu1 %v763_v8  ;;  %1062 = vmatpush.msra.mxu3 %v763_v8 }
 0x17d   : > { %796 = vmatpush.msra.mxu1 %v762_v41  ;;  %1063 = vmatpush.msra.mxu3 %v762_v41 }
 0x17f   : > { %797 = vmatpush.msra.mxu1 %v761_v18  ;;  %1064 = vmatpush.msra.mxu3 %v761_v18  ;;  %v848_v2 = vpop.permute.xlu0 %847 }
 0x181   : > { %798 = vmatpush.msra.mxu1 %v760_v43  ;;  %1065 = vmatpush.msra.mxu3 %v760_v43 }
 0x183   : > { %799 = vmatpush.msra.mxu1 %v759_v53  ;;  %1066 = vmatpush.msra.mxu3 %v759_v53 }
 0x184   : > { %1045 = vmatmul.msk.f32.vlgmr.msra.gmra.mxu1 %vm771_vm4, %v767_v16  ;;  %1046 = vmatmul.msk.f32.vlgmr.msra.gmra.mxu3 %vm771_vm4, %v768_v59 }
 0x18c   : > { %1047 = vmatmul.msk.f32.gmra.mxu3 %vm771_vm4, %v769_v28 }
 0x194   : > { %1048 = vmatmul.msk.f32.gmra.mxu3 %vm771_vm4, %v770_v15 }
 0x201   : > { %v801_v57 = vpop.f32.mrf.mxu1 }
 0x202   : > { %v837_v63 = vmul.f32 %v820_v54, %v801_v57 }
 0x204   : > { %v865_v3 = vadd.f32 %v848_v2, %v837_v63 }
 0x206   : > { %v869_v4 = vadd.f32 %v865_v3, %v1410_v45  ;;  %v863_v45 = vpop.permute.xlu0 %862 }
 0x207   : > { %v804_v50 = vpop.f32.mrf.mxu3 }
 0x208   : > { %873 = vst [vmem:[%s379_s22] sm:$0xff] %v869_v4  ;;  %v838_v1 = vmul.f32 %v825_v30, %v804_v50 }
 0x20a   : > { %v866_v0 = vadd.f32 %v853_v7, %v838_v1 }
 0x20c   : > { %v870_v9 = vadd.f32 %v866_v0, %v1406_v44 }
 0x20e   : > { %874 = vst [vmem:[%s379_s22 + $0x8] sm:$0xff] %v870_v9 }
 0x20f   : > { %v807_v10 = vpop.f32.mrf.mxu3  ;;  %v922_v44 = vld [vmem:[%s379_s22] sm:$0xff] (%p1309_p6) }
 0x210   : > { %v839_v11 = vmul.f32 %v830_v55, %v807_v10  ;;  %923 = vst [vmem:[%s887_s26] sm:$0xff] (%p1309_p6), %v922_v44 }
 0x212   : > { %v867_v13 = vadd.f32 %v858_v12, %v839_v11 }
 0x214   : > { %v871_v14 = vadd.f32 %v867_v13, %v1404_v42 }
 0x215   : > { %v924_v21 = vld [vmem:[%s379_s22 + $0x8] sm:$0xff] (%p1309_p6) }
 0x216   : > { %875 = vst [vmem:[%s379_s22 + $0x10] sm:$0xff] %v871_v14 }
 0x217   : > { %v810_v17 = vpop.f32.mrf.mxu3  ;;  %925 = vst [vmem:[%s887_s26 + $0x10] sm:$0xff] (%p1309_p6), %v924_v21 }
 0x218   : > { %v840_v19 = vmul.f32 %v835_v5, %v810_v17 }
 0x21a   : > { %v868_v20 = vadd.f32 %v863_v45, %v840_v19  ;;  %883 = sbr.rel (!%p1309_p6) target bundleno = 551 (0x227), region = 94 }
 0x21c   : > { %v872_v62 = vadd.f32 %v868_v20, %v1397_v33 }
 0x21d   : > { %v926_v42 = vld [vmem:[%s379_s22 + $0x10] sm:$0xff] (%p1309_p6) }
 0x21e   : > { %876 = vst [vmem:[%s379_s22 + $0x18] sm:$0xff] %v872_v62 }
 0x21f   : > { %927 = vst [vmem:[%s887_s26 + $0x20] sm:$0xff] %v926_v42 }
 0x225   : > { %v928_v22 = vld [vmem:[%s379_s22 + $0x18] sm:$0xff] }
 0x226   : > { %929 = vst [vmem:[%s887_s26 + $0x30] sm:$0xff] %v928_v22 }
 0x227 PF: > { %s18_s11 = sadd.s32 1, %s1213_s11   ;;  %s1733_s27 = smov %s1193_s28 }
 0x228   : > { %p15_p13 = scmp.ge.s32.totalorder %s18_s11, 6   ;;  %s1734_s28 = smov %s1317_s20 }
 0x229   : > { %s1735_s29 = smov %s1205_s9  ;;  %s1736_s30 = smov %s1209_s10 }
 0x22a   : > { %s1737_s9 = smov %s1740_s12  ;;  %s1738_s10 = smov %s1744_s13 }
 0x22b   :  { %17 = sbr.rel (!%p15_p13) target bundleno = 4 (0x4), region = 166 }

</bundles_post_ra>
